<compile_context>
chip_gen: v7x
topology: tpu7x:2x2x1
jax: 0.10.0
libtpu: 0.0.40
codegen_flags: <defaults>
</compile_context>

<pallas_src>
from functools import partial

import jax
import jax.numpy as jnp
from jax.experimental import pallas as pl
from jax.experimental.pallas import tpu as pltpu


def _lstm_kernel(x_ref, wih_ref, whh_ref, b_ref, out_ref, *, seq_len):
    """Single-invocation LSTM forward.

    x_ref  : (T*B, D) bf16   time-major flattened input
    wih_ref: (D, 4H)  bf16   W_ih^T, i/f/o columns pre-scaled by 0.5
    whh_ref: (H, 4H)  bf16   W_hh^T, i/f/o columns pre-scaled by 0.5
    b_ref  : (1, 4H)  f32    (b_ih + b_hh), i/f/o columns pre-scaled by 0.5
    out_ref: (B, H)          hidden state at the last time step
    """
    TB, _ = x_ref.shape
    T = seq_len
    B = TB // T
    H4 = whh_ref.shape[1]
    H = H4 // 4

    # Input projection for ALL time steps: one MXU matmul, bias fused.
    # Output is time-major so each per-step slice is contiguous sublanes.
    gx = (jnp.dot(x_ref[...], wih_ref[...], preferred_element_type=jnp.float32)
          + b_ref[...])                         # (T*B, 4H) f32
    gx = gx.reshape(T, B, H4)                   # (T, B, 4H) time-major

    whh = whh_ref[...]                          # (H, 4H) bf16, resident RHS

    # Per-column FMA constants (gate order [i, f, g, o]): i/f/o pre-activations
    # arrive pre-scaled by 0.5, so sigmoid(z) = 0.5*tanh(z/2) + 0.5; the g
    # column is unscaled and just takes tanh. One full-vreg tanh + one FMA
    # produces all four activations. Hoisted out of the T loop.
    col = jax.lax.broadcasted_iota(jnp.int32, (1, H4), 1)
    is_g = (col >= 2 * H) & (col < 3 * H)
    a_scale = jnp.where(is_g, 1.0, 0.5).astype(jnp.float32)
    b_shift = jnp.where(is_g, 0.0, 0.5).astype(jnp.float32)

    h = jnp.zeros((B, H), jnp.float32)
    c = jnp.zeros((B, H), jnp.float32)

    # Fully-unrolled recurrence; only the hidden-to-hidden matmul (whh as the
    # constant RHS) plus 2 EUP passes remain on the serial critical path.
    for t in range(T):
        pre = gx[t] + jnp.dot(h.astype(jnp.bfloat16), whh,
                              preferred_element_type=jnp.float32)   # (B, 4H)
        act = jnp.tanh(pre) * a_scale + b_shift                     # 1 EUP pass
        i_g = act[:, 0 * H:1 * H]
        f_g = act[:, 1 * H:2 * H]
        g_g = act[:, 2 * H:3 * H]
        o_g = act[:, 3 * H:4 * H]
        c = f_g * c + i_g * g_g
        h = o_g * jnp.tanh(c)                                       # 2nd EUP pass

    out_ref[...] = h.astype(out_ref.dtype)


@jax.jit
def lstm_encoding(x, w_ih, w_hh, b_ih, b_hh):
    """x: (B, T, D). Returns lstm(x)[0][:, -1, :] with zero initial (h, c),
    matching PyTorch nn.LSTM(batch_first=True, num_layers=1)."""
    B, T, D = x.shape
    H = w_hh.shape[1]
    assert w_ih.shape == (4 * H, D)
    assert w_hh.shape == (4 * H, H)
    out_dtype = x.dtype

    # Parameter prep (fused into this jitted executable; for a served model
    # these would be computed once and cached). Gate order [i, f, g, o]:
    # pre-scale i/f/o columns by 0.5 for the tanh-based sigmoid identity.
    col_scale = jnp.concatenate([
        jnp.full((H,), 0.5, jnp.float32),   # i
        jnp.full((H,), 0.5, jnp.float32),   # f
        jnp.full((H,), 1.0, jnp.float32),   # g
        jnp.full((H,), 0.5, jnp.float32),   # o
    ])
    wih_t = (w_ih.T * col_scale).astype(jnp.bfloat16)             # (D, 4H)
    whh_t = (w_hh.T * col_scale).astype(jnp.bfloat16)             # (H, 4H)
    bias = ((b_ih + b_hh) * col_scale).reshape(1, 4 * H).astype(jnp.float32)

    # Time-major, flattened input so the kernel's per-step gx slice is a
    # contiguous sublane slice (this transpose is a tiny fused XLA op, not a
    # separate dispatch, and is off the serial per-step critical path).
    x_tm = jnp.transpose(x, (1, 0, 2)).reshape(T * B, D).astype(jnp.bfloat16)

    def vmem():
        return pl.BlockSpec(memory_space=pltpu.MemorySpace.VMEM)

    # Whole problem (a few KB at these shapes) lives in VMEM for a single
    # kernel invocation: no grid -> no per-time-step pipeline overhead and
    # grid-invariant weights are single-buffered.
    return pl.pallas_call(
        partial(_lstm_kernel, seq_len=T),
        out_shape=jax.ShapeDtypeStruct((B, H), out_dtype),
        in_specs=[vmem(), vmem(), vmem(), vmem()],
        out_specs=vmem(),
    )(x_tm, wih_t, whh_t, bias)


def _lstm_reference(x, w_ih, w_hh, b_ih, b_hh):
    """Pure-JAX f32 reference mirroring torch.nn.LSTM (batch_first, 1 layer)."""
    B, T, D = x.shape
    H = w_hh.shape[1]
    h = jnp.zeros((B, H), jnp.float32)
    c = jnp.zeros((B, H), jnp.float32)

    def step(carry, x_t):
        h, c = carry
        gates = x_t @ w_ih.T + h @ w_hh.T + b_ih + b_hh
        i = jax.nn.sigmoid(gates[:, 0 * H:1 * H])
        f = jax.nn.sigmoid(gates[:, 1 * H:2 * H])
        g = jnp.tanh(gates[:, 2 * H:3 * H])
        o = jax.nn.sigmoid(gates[:, 3 * H:4 * H])
        c = f * c + i * g
        h = o * jnp.tanh(c)
        return (h, c), None

    (h, c), _ = jax.lax.scan(step, (h, c), jnp.transpose(x, (1, 0, 2)))
    return h


if __name__ == "__main__":
    # Small shapes consistent with the module: batch=2, seq=8,
    # lstm_input_dim=16, lstm_hidden_dim=32.
    B, T, D_IN, H = 2, 8, 16, 32

    key = jax.random.PRNGKey(0)
    kx, k1, k2, k3, k4 = jax.random.split(key, 5)

    x = jax.random.normal(kx, (B, T, D_IN), dtype=jnp.float32)

    # Deterministic parameter init, PyTorch scheme: U(-1/sqrt(H), 1/sqrt(H)).
    bound = 1.0 / jnp.sqrt(jnp.float32(H))
    w_ih = jax.random.uniform(k1, (4 * H, D_IN), jnp.float32, -bound, bound)
    w_hh = jax.random.uniform(k2, (4 * H, H), jnp.float32, -bound, bound)
    b_ih = jax.random.uniform(k3, (4 * H,), jnp.float32, -bound, bound)
    b_hh = jax.random.uniform(k4, (4 * H,), jnp.float32, -bound, bound)

    out = lstm_encoding(x, w_ih, w_hh, b_ih, b_hh)
    out = jax.block_until_ready(out)

    ref = _lstm_reference(x, w_ih, w_hh, b_ih, b_hh)
    assert out.shape == (B, H)
    # Tolerance loosened vs. the f32 reference because the MXU matmuls use
    # bf16 operands (review item); the tanh-based sigmoid identity itself is
    # exact up to ulps.
    max_err = float(jnp.max(jnp.abs(out - ref)))
    assert jnp.allclose(out, ref, atol=2e-2, rtol=2e-2), (
        f"mismatch vs reference (max abs err {max_err})")

    print("KERNEL_OK")
</pallas_src>

<mosaic_0001>
module attributes {stable_mosaic.version = 11 : i64} {
  func.func @_lstm_kernel(%arg0: memref<16x16xbf16, #tpu.memory_space<vmem>>, %arg1: memref<16x128xbf16, #tpu.memory_space<vmem>>, %arg2: memref<32x128xbf16, #tpu.memory_space<vmem>>, %arg3: memref<1x128xf32, #tpu.memory_space<vmem>>, %arg4: memref<2x32xf32, #tpu.memory_space<vmem>>) attributes {dimension_semantics = [], scalar_prefetch = 0 : i64, scratch_operands = 0 : i64, tpu.core_type = #tpu.core_type<tc>} {
    %c0 = arith.constant 0 : index
    %c0_0 = arith.constant 0 : index
    %0 = vector.load %arg0[%c0, %c0_0] : memref<16x16xbf16, #tpu.memory_space<vmem>>, vector<16x16xbf16>
    %c0_1 = arith.constant 0 : index
    %c0_2 = arith.constant 0 : index
    %1 = vector.load %arg1[%c0_1, %c0_2] : memref<16x128xbf16, #tpu.memory_space<vmem>>, vector<16x128xbf16>
    %cst = arith.constant dense<0.000000e+00> : vector<16x128xf32>
    %2 = tpu.matmul %0, %1, %cst {dimension_numbers = #tpu.dot_dimension_numbers<[1], [0], [0], [1], [0, 0, 1, 1], [], []>} : vector<16x16xbf16>, vector<16x128xbf16>, vector<16x128xf32> -> vector<16x128xf32>
    %c0_3 = arith.constant 0 : index
    %c0_4 = arith.constant 0 : index
    %3 = vector.load %arg3[%c0_3, %c0_4] : memref<1x128xf32, #tpu.memory_space<vmem>>, vector<1x128xf32>
    %4 = vector.broadcast %3 : vector<1x128xf32> to vector<16x128xf32>
    %5 = arith.addf %2, %4 : vector<16x128xf32>
    %6 = vector.shape_cast %5 : vector<16x128xf32> to vector<8x2x128xf32>
    %c0_5 = arith.constant 0 : index
    %c0_6 = arith.constant 0 : index
    %7 = vector.load %arg2[%c0_5, %c0_6] : memref<32x128xbf16, #tpu.memory_space<vmem>>, vector<32x128xbf16>
    %8 = tpu.iota {dimensions = array<i32: 1>} : vector<1x128xi32>
    %c64_i32 = arith.constant 64 : i32
    %9 = vector.broadcast %c64_i32 : i32 to vector<1x128xi32>
    %10 = arith.cmpi sge, %8, %9 : vector<1x128xi32>
    %c96_i32 = arith.constant 96 : i32
    %11 = vector.broadcast %c96_i32 : i32 to vector<1x128xi32>
    %12 = arith.cmpi slt, %8, %11 : vector<1x128xi32>
    %13 = arith.andi %10, %12 : vector<1x128xi1>
    %cst_7 = arith.constant 1.000000e+00 : f32
    %cst_8 = arith.constant 5.000000e-01 : f32
    %14 = vector.broadcast %cst_7 : f32 to vector<1x128xf32>
    %15 = vector.broadcast %cst_8 : f32 to vector<1x128xf32>
    %16 = arith.select %13, %14, %15 : vector<1x128xi1>, vector<1x128xf32>
    %cst_9 = arith.constant 0.000000e+00 : f32
    %cst_10 = arith.constant 5.000000e-01 : f32
    %17 = vector.broadcast %cst_9 : f32 to vector<1x128xf32>
    %18 = vector.broadcast %cst_10 : f32 to vector<1x128xf32>
    %19 = arith.select %13, %17, %18 : vector<1x128xi1>, vector<1x128xf32>
    %cst_11 = arith.constant 0.000000e+00 : f32
    %20 = vector.broadcast %cst_11 : f32 to vector<2x32xf32>
    %cst_12 = arith.constant 0.000000e+00 : f32
    %21 = vector.broadcast %cst_12 : f32 to vector<2x32xf32>
    %22 = vector.extract_strided_slice %6 {offsets = [0, 0, 0], sizes = [1, 2, 128], strides = [1, 1, 1]} : vector<8x2x128xf32> to vector<1x2x128xf32>
    %23 = vector.shape_cast %22 : vector<1x2x128xf32> to vector<2x128xf32>
    %24 = arith.truncf %20 : vector<2x32xf32> to vector<2x32xbf16>
    %cst_13 = arith.constant dense<0.000000e+00> : vector<2x128xf32>
    %25 = tpu.matmul %24, %7, %cst_13 {dimension_numbers = #tpu.dot_dimension_numbers<[1], [0], [0], [1], [0, 0, 1, 1], [], []>} : vector<2x32xbf16>, vector<32x128xbf16>, vector<2x128xf32> -> vector<2x128xf32>
    %26 = arith.addf %23, %25 : vector<2x128xf32>
    %27 = math.tanh %26 : vector<2x128xf32>
    %28 = vector.broadcast %16 : vector<1x128xf32> to vector<2x128xf32>
    %29 = arith.mulf %27, %28 : vector<2x128xf32>
    %30 = vector.broadcast %19 : vector<1x128xf32> to vector<2x128xf32>
    %31 = arith.addf %29, %30 : vector<2x128xf32>
    %32 = vector.extract_strided_slice %31 {offsets = [0, 0], sizes = [2, 32], strides = [1, 1]} : vector<2x128xf32> to vector<2x32xf32>
    %33 = vector.extract_strided_slice %31 {offsets = [0, 32], sizes = [2, 32], strides = [1, 1]} : vector<2x128xf32> to vector<2x32xf32>
    %34 = vector.extract_strided_slice %31 {offsets = [0, 64], sizes = [2, 32], strides = [1, 1]} : vector<2x128xf32> to vector<2x32xf32>
    %35 = vector.extract_strided_slice %31 {offsets = [0, 96], sizes = [2, 32], strides = [1, 1]} : vector<2x128xf32> to vector<2x32xf32>
    %36 = arith.mulf %33, %21 : vector<2x32xf32>
    %37 = arith.mulf %32, %34 : vector<2x32xf32>
    %38 = arith.addf %36, %37 : vector<2x32xf32>
    %39 = math.tanh %38 : vector<2x32xf32>
    %40 = arith.mulf %35, %39 : vector<2x32xf32>
    %41 = vector.extract_strided_slice %6 {offsets = [1, 0, 0], sizes = [1, 2, 128], strides = [1, 1, 1]} : vector<8x2x128xf32> to vector<1x2x128xf32>
    %42 = vector.shape_cast %41 : vector<1x2x128xf32> to vector<2x128xf32>
    %43 = arith.truncf %40 : vector<2x32xf32> to vector<2x32xbf16>
    %cst_14 = arith.constant dense<0.000000e+00> : vector<2x128xf32>
    %44 = tpu.matmul %43, %7, %cst_14 {dimension_numbers = #tpu.dot_dimension_numbers<[1], [0], [0], [1], [0, 0, 1, 1], [], []>} : vector<2x32xbf16>, vector<32x128xbf16>, vector<2x128xf32> -> vector<2x128xf32>
    %45 = arith.addf %42, %44 : vector<2x128xf32>
    %46 = math.tanh %45 : vector<2x128xf32>
    %47 = vector.broadcast %16 : vector<1x128xf32> to vector<2x128xf32>
    %48 = arith.mulf %46, %47 : vector<2x128xf32>
    %49 = vector.broadcast %19 : vector<1x128xf32> to vector<2x128xf32>
    %50 = arith.addf %48, %49 : vector<2x128xf32>
    %51 = vector.extract_strided_slice %50 {offsets = [0, 0], sizes = [2, 32], strides = [1, 1]} : vector<2x128xf32> to vector<2x32xf32>
    %52 = vector.extract_strided_slice %50 {offsets = [0, 32], sizes = [2, 32], strides = [1, 1]} : vector<2x128xf32> to vector<2x32xf32>
    %53 = vector.extract_strided_slice %50 {offsets = [0, 64], sizes = [2, 32], strides = [1, 1]} : vector<2x128xf32> to vector<2x32xf32>
    %54 = vector.extract_strided_slice %50 {offsets = [0, 96], sizes = [2, 32], strides = [1, 1]} : vector<2x128xf32> to vector<2x32xf32>
    %55 = arith.mulf %52, %38 : vector<2x32xf32>
    %56 = arith.mulf %51, %53 : vector<2x32xf32>
    %57 = arith.addf %55, %56 : vector<2x32xf32>
    %58 = math.tanh %57 : vector<2x32xf32>
    %59 = arith.mulf %54, %58 : vector<2x32xf32>
    %60 = vector.extract_strided_slice %6 {offsets = [2, 0, 0], sizes = [1, 2, 128], strides = [1, 1, 1]} : vector<8x2x128xf32> to vector<1x2x128xf32>
    %61 = vector.shape_cast %60 : vector<1x2x128xf32> to vector<2x128xf32>
    %62 = arith.truncf %59 : vector<2x32xf32> to vector<2x32xbf16>
    %cst_15 = arith.constant dense<0.000000e+00> : vector<2x128xf32>
    %63 = tpu.matmul %62, %7, %cst_15 {dimension_numbers = #tpu.dot_dimension_numbers<[1], [0], [0], [1], [0, 0, 1, 1], [], []>} : vector<2x32xbf16>, vector<32x128xbf16>, vector<2x128xf32> -> vector<2x128xf32>
    %64 = arith.addf %61, %63 : vector<2x128xf32>
    %65 = math.tanh %64 : vector<2x128xf32>
    %66 = vector.broadcast %16 : vector<1x128xf32> to vector<2x128xf32>
    %67 = arith.mulf %65, %66 : vector<2x128xf32>
    %68 = vector.broadcast %19 : vector<1x128xf32> to vector<2x128xf32>
    %69 = arith.addf %67, %68 : vector<2x128xf32>
    %70 = vector.extract_strided_slice %69 {offsets = [0, 0], sizes = [2, 32], strides = [1, 1]} : vector<2x128xf32> to vector<2x32xf32>
    %71 = vector.extract_strided_slice %69 {offsets = [0, 32], sizes = [2, 32], strides = [1, 1]} : vector<2x128xf32> to vector<2x32xf32>
    %72 = vector.extract_strided_slice %69 {offsets = [0, 64], sizes = [2, 32], strides = [1, 1]} : vector<2x128xf32> to vector<2x32xf32>
    %73 = vector.extract_strided_slice %69 {offsets = [0, 96], sizes = [2, 32], strides = [1, 1]} : vector<2x128xf32> to vector<2x32xf32>
    %74 = arith.mulf %71, %57 : vector<2x32xf32>
    %75 = arith.mulf %70, %72 : vector<2x32xf32>
    %76 = arith.addf %74, %75 : vector<2x32xf32>
    %77 = math.tanh %76 : vector<2x32xf32>
    %78 = arith.mulf %73, %77 : vector<2x32xf32>
    %79 = vector.extract_strided_slice %6 {offsets = [3, 0, 0], sizes = [1, 2, 128], strides = [1, 1, 1]} : vector<8x2x128xf32> to vector<1x2x128xf32>
    %80 = vector.shape_cast %79 : vector<1x2x128xf32> to vector<2x128xf32>
    %81 = arith.truncf %78 : vector<2x32xf32> to vector<2x32xbf16>
    %cst_16 = arith.constant dense<0.000000e+00> : vector<2x128xf32>
    %82 = tpu.matmul %81, %7, %cst_16 {dimension_numbers = #tpu.dot_dimension_numbers<[1], [0], [0], [1], [0, 0, 1, 1], [], []>} : vector<2x32xbf16>, vector<32x128xbf16>, vector<2x128xf32> -> vector<2x128xf32>
    %83 = arith.addf %80, %82 : vector<2x128xf32>
    %84 = math.tanh %83 : vector<2x128xf32>
    %85 = vector.broadcast %16 : vector<1x128xf32> to vector<2x128xf32>
    %86 = arith.mulf %84, %85 : vector<2x128xf32>
    %87 = vector.broadcast %19 : vector<1x128xf32> to vector<2x128xf32>
    %88 = arith.addf %86, %87 : vector<2x128xf32>
    %89 = vector.extract_strided_slice %88 {offsets = [0, 0], sizes = [2, 32], strides = [1, 1]} : vector<2x128xf32> to vector<2x32xf32>
    %90 = vector.extract_strided_slice %88 {offsets = [0, 32], sizes = [2, 32], strides = [1, 1]} : vector<2x128xf32> to vector<2x32xf32>
    %91 = vector.extract_strided_slice %88 {offsets = [0, 64], sizes = [2, 32], strides = [1, 1]} : vector<2x128xf32> to vector<2x32xf32>
    %92 = vector.extract_strided_slice %88 {offsets = [0, 96], sizes = [2, 32], strides = [1, 1]} : vector<2x128xf32> to vector<2x32xf32>
    %93 = arith.mulf %90, %76 : vector<2x32xf32>
    %94 = arith.mulf %89, %91 : vector<2x32xf32>
    %95 = arith.addf %93, %94 : vector<2x32xf32>
    %96 = math.tanh %95 : vector<2x32xf32>
    %97 = arith.mulf %92, %96 : vector<2x32xf32>
    %98 = vector.extract_strided_slice %6 {offsets = [4, 0, 0], sizes = [1, 2, 128], strides = [1, 1, 1]} : vector<8x2x128xf32> to vector<1x2x128xf32>
    %99 = vector.shape_cast %98 : vector<1x2x128xf32> to vector<2x128xf32>
    %100 = arith.truncf %97 : vector<2x32xf32> to vector<2x32xbf16>
    %cst_17 = arith.constant dense<0.000000e+00> : vector<2x128xf32>
    %101 = tpu.matmul %100, %7, %cst_17 {dimension_numbers = #tpu.dot_dimension_numbers<[1], [0], [0], [1], [0, 0, 1, 1], [], []>} : vector<2x32xbf16>, vector<32x128xbf16>, vector<2x128xf32> -> vector<2x128xf32>
    %102 = arith.addf %99, %101 : vector<2x128xf32>
    %103 = math.tanh %102 : vector<2x128xf32>
    %104 = vector.broadcast %16 : vector<1x128xf32> to vector<2x128xf32>
    %105 = arith.mulf %103, %104 : vector<2x128xf32>
    %106 = vector.broadcast %19 : vector<1x128xf32> to vector<2x128xf32>
    %107 = arith.addf %105, %106 : vector<2x128xf32>
    %108 = vector.extract_strided_slice %107 {offsets = [0, 0], sizes = [2, 32], strides = [1, 1]} : vector<2x128xf32> to vector<2x32xf32>
    %109 = vector.extract_strided_slice %107 {offsets = [0, 32], sizes = [2, 32], strides = [1, 1]} : vector<2x128xf32> to vector<2x32xf32>
    %110 = vector.extract_strided_slice %107 {offsets = [0, 64], sizes = [2, 32], strides = [1, 1]} : vector<2x128xf32> to vector<2x32xf32>
    %111 = vector.extract_strided_slice %107 {offsets = [0, 96], sizes = [2, 32], strides = [1, 1]} : vector<2x128xf32> to vector<2x32xf32>
    %112 = arith.mulf %109, %95 : vector<2x32xf32>
    %113 = arith.mulf %108, %110 : vector<2x32xf32>
    %114 = arith.addf %112, %113 : vector<2x32xf32>
    %115 = math.tanh %114 : vector<2x32xf32>
    %116 = arith.mulf %111, %115 : vector<2x32xf32>
    %117 = vector.extract_strided_slice %6 {offsets = [5, 0, 0], sizes = [1, 2, 128], strides = [1, 1, 1]} : vector<8x2x128xf32> to vector<1x2x128xf32>
    %118 = vector.shape_cast %117 : vector<1x2x128xf32> to vector<2x128xf32>
    %119 = arith.truncf %116 : vector<2x32xf32> to vector<2x32xbf16>
    %cst_18 = arith.constant dense<0.000000e+00> : vector<2x128xf32>
    %120 = tpu.matmul %119, %7, %cst_18 {dimension_numbers = #tpu.dot_dimension_numbers<[1], [0], [0], [1], [0, 0, 1, 1], [], []>} : vector<2x32xbf16>, vector<32x128xbf16>, vector<2x128xf32> -> vector<2x128xf32>
    %121 = arith.addf %118, %120 : vector<2x128xf32>
    %122 = math.tanh %121 : vector<2x128xf32>
    %123 = vector.broadcast %16 : vector<1x128xf32> to vector<2x128xf32>
    %124 = arith.mulf %122, %123 : vector<2x128xf32>
    %125 = vector.broadcast %19 : vector<1x128xf32> to vector<2x128xf32>
    %126 = arith.addf %124, %125 : vector<2x128xf32>
    %127 = vector.extract_strided_slice %126 {offsets = [0, 0], sizes = [2, 32], strides = [1, 1]} : vector<2x128xf32> to vector<2x32xf32>
    %128 = vector.extract_strided_slice %126 {offsets = [0, 32], sizes = [2, 32], strides = [1, 1]} : vector<2x128xf32> to vector<2x32xf32>
    %129 = vector.extract_strided_slice %126 {offsets = [0, 64], sizes = [2, 32], strides = [1, 1]} : vector<2x128xf32> to vector<2x32xf32>
    %130 = vector.extract_strided_slice %126 {offsets = [0, 96], sizes = [2, 32], strides = [1, 1]} : vector<2x128xf32> to vector<2x32xf32>
    %131 = arith.mulf %128, %114 : vector<2x32xf32>
    %132 = arith.mulf %127, %129 : vector<2x32xf32>
    %133 = arith.addf %131, %132 : vector<2x32xf32>
    %134 = math.tanh %133 : vector<2x32xf32>
    %135 = arith.mulf %130, %134 : vector<2x32xf32>
    %136 = vector.extract_strided_slice %6 {offsets = [6, 0, 0], sizes = [1, 2, 128], strides = [1, 1, 1]} : vector<8x2x128xf32> to vector<1x2x128xf32>
    %137 = vector.shape_cast %136 : vector<1x2x128xf32> to vector<2x128xf32>
    %138 = arith.truncf %135 : vector<2x32xf32> to vector<2x32xbf16>
    %cst_19 = arith.constant dense<0.000000e+00> : vector<2x128xf32>
    %139 = tpu.matmul %138, %7, %cst_19 {dimension_numbers = #tpu.dot_dimension_numbers<[1], [0], [0], [1], [0, 0, 1, 1], [], []>} : vector<2x32xbf16>, vector<32x128xbf16>, vector<2x128xf32> -> vector<2x128xf32>
    %140 = arith.addf %137, %139 : vector<2x128xf32>
    %141 = math.tanh %140 : vector<2x128xf32>
    %142 = vector.broadcast %16 : vector<1x128xf32> to vector<2x128xf32>
    %143 = arith.mulf %141, %142 : vector<2x128xf32>
    %144 = vector.broadcast %19 : vector<1x128xf32> to vector<2x128xf32>
    %145 = arith.addf %143, %144 : vector<2x128xf32>
    %146 = vector.extract_strided_slice %145 {offsets = [0, 0], sizes = [2, 32], strides = [1, 1]} : vector<2x128xf32> to vector<2x32xf32>
    %147 = vector.extract_strided_slice %145 {offsets = [0, 32], sizes = [2, 32], strides = [1, 1]} : vector<2x128xf32> to vector<2x32xf32>
    %148 = vector.extract_strided_slice %145 {offsets = [0, 64], sizes = [2, 32], strides = [1, 1]} : vector<2x128xf32> to vector<2x32xf32>
    %149 = vector.extract_strided_slice %145 {offsets = [0, 96], sizes = [2, 32], strides = [1, 1]} : vector<2x128xf32> to vector<2x32xf32>
    %150 = arith.mulf %147, %133 : vector<2x32xf32>
    %151 = arith.mulf %146, %148 : vector<2x32xf32>
    %152 = arith.addf %150, %151 : vector<2x32xf32>
    %153 = math.tanh %152 : vector<2x32xf32>
    %154 = arith.mulf %149, %153 : vector<2x32xf32>
    %155 = vector.extract_strided_slice %6 {offsets = [7, 0, 0], sizes = [1, 2, 128], strides = [1, 1, 1]} : vector<8x2x128xf32> to vector<1x2x128xf32>
    %156 = vector.shape_cast %155 : vector<1x2x128xf32> to vector<2x128xf32>
    %157 = arith.truncf %154 : vector<2x32xf32> to vector<2x32xbf16>
    %cst_20 = arith.constant dense<0.000000e+00> : vector<2x128xf32>
    %158 = tpu.matmul %157, %7, %cst_20 {dimension_numbers = #tpu.dot_dimension_numbers<[1], [0], [0], [1], [0, 0, 1, 1], [], []>} : vector<2x32xbf16>, vector<32x128xbf16>, vector<2x128xf32> -> vector<2x128xf32>
    %159 = arith.addf %156, %158 : vector<2x128xf32>
    %160 = math.tanh %159 : vector<2x128xf32>
    %161 = vector.broadcast %16 : vector<1x128xf32> to vector<2x128xf32>
    %162 = arith.mulf %160, %161 : vector<2x128xf32>
    %163 = vector.broadcast %19 : vector<1x128xf32> to vector<2x128xf32>
    %164 = arith.addf %162, %163 : vector<2x128xf32>
    %165 = vector.extract_strided_slice %164 {offsets = [0, 0], sizes = [2, 32], strides = [1, 1]} : vector<2x128xf32> to vector<2x32xf32>
    %166 = vector.extract_strided_slice %164 {offsets = [0, 32], sizes = [2, 32], strides = [1, 1]} : vector<2x128xf32> to vector<2x32xf32>
    %167 = vector.extract_strided_slice %164 {offsets = [0, 64], sizes = [2, 32], strides = [1, 1]} : vector<2x128xf32> to vector<2x32xf32>
    %168 = vector.extract_strided_slice %164 {offsets = [0, 96], sizes = [2, 32], strides = [1, 1]} : vector<2x128xf32> to vector<2x32xf32>
    %169 = arith.mulf %166, %152 : vector<2x32xf32>
    %170 = arith.mulf %165, %167 : vector<2x32xf32>
    %171 = arith.addf %169, %170 : vector<2x32xf32>
    %172 = math.tanh %171 : vector<2x32xf32>
    %173 = arith.mulf %168, %172 : vector<2x32xf32>
    %c0_21 = arith.constant 0 : index
    %c0_22 = arith.constant 0 : index
    %174 = vector.load %arg4[%c0_21, %c0_22] : memref<2x32xf32, #tpu.memory_space<vmem>>, vector<2x32xf32>
    tpu.vector_store %arg4[%c0_21, %c0_22], %173 {strides = array<i32>} : memref<2x32xf32, #tpu.memory_space<vmem>>, vector<2x32xf32>,
    return
  }
}

</mosaic_0001>

<bundles_post_ra>
// kernel: lstm_encoding.1
= control target key start
LH: loop header
LB: loop body
LE: loop exit
PB: predicated region body
PF: predicated region fallthrough
CT: control target
= control target key end

     0   :  { %v898_v1 = vmov 0.0   ;;  %vm899_vm0 = vmmov 0   ;;  %vm41_vm1 = vcmask 130048   ;;  %s1089_s0 = inlined_call_operand.vmem [shape: bf16[16,16], index: 0, kind: input, shape index: {}]   ;;  %s1090_s1 = inlined_call_operand.vmem [shape: bf16[16,128], index: 1, kind: input, shape index: {}]   ;;  %s1091_s2 = inlined_call_operand.vmem [shape: bf16[32,128], index: 2, kind: input, shape index: {}]   ;;  %s1092_s3 = inlined_call_operand.vmem [shape: f32[1,128], index: 3, kind: input, shape index: {}]   ;;  %s1093_s4 = inlined_call_operand.hbm [shape: f32[2,32], index: 4, kind: output, shape index: {}]  }
   0x1   :  { %v838_v0 = vld [vmem:[%s1090_s1] sm:$0xff]   ;;  %760 = vmatprep.subr.bf16.mxu0 %v898_v1  ;;  %766 = vmatprep.subr.bf16.mxu1 %v898_v1  ;;  %v950_v4 = vld [vmem:[%s1091_s2 + $0x8] sm:$0xff]  }
   0x2   :  { %v939_v2 = vld [vmem:[%s1091_s2] sm:$0xff]   ;;  %761 = vmatpush3.bf16.msra.mxu0 %v838_v0  ;;  %762 = vmatprep.mubr.msk.bf16.mxu0 %vm899_vm0, %v898_v1 }
   0x3   :  { %v840_v3 = vld [vmem:[%s1089_s0] sm:$0xff]   ;;  %767 = vmatpush3.bf16.msra.mxu1 %v939_v2  ;;  %770 = vmatprep.mubr.msk.bf16.mxu1 %vm899_vm0, %v898_v1 }
   0x4   :  { %768 = vmatprep.subr.bf16.mxu1 %v898_v1  ;;  %774 = vmatprep.subr.bf16.mxu0 %v898_v1 }
   0x5   :  { %9 = vsyncpa [#allocation3], 0  ;;  %763 = vmatmul.mubr.msk.bf16.vlgmr.msra.gmra.mrb[0].mxu0 %vm41_vm1, %v840_v3  ;;  %v900_v5 = vmov 0   ;;  %v901_v6 = vmov 1983009808   ;;  %v92_v8 = vlaneseq  ;;  %v902_v26 = vmov 0.5  }
   0x6   :  { %775 = vmatpush3.bf16.msra.mxu0 %v939_v2  ;;  %778 = vmatprep.mubr.msk.bf16.mxu0 %vm899_vm0, %v898_v1  ;;  %v90_v7 = vunpack.c.l.s4 %v901_v6  ;;  %v721_v11 = vld [vmem:[%s1092_s3] ss:$0 sm:$0xff]  ;;  %s903_s3 = smov 64   ;;  %s904_s22 = smov 32   ;;  %vm153_vm5 = vcmask 261120   ;;  %vm705_vm6 = vcmask 254976  }
   0x7   :  { %769 = vmatpush3.bf16.msra.mxu1 %v950_v4  ;;  %776 = vmatprep.subr.bf16.mxu0 %v898_v1  ;;  %v93_v10 = vshrl.u32 %v92_v8, 7  ;;  %v135_v21 = vand.u32 127, %v92_v8  ;;  %s905_s23 = smov [#allocation2]  }
   0x8   :  { %782 = vmatprep.subr.bf16.mxu1 %v898_v1  ;;  %v91_v9 = vunpack.c.0.s8 %v90_v7  ;;  %s713_s24 = sshll.u32 %s905_s23, 4  ;;  %s714_s24 = int_to_ptr.vmem [resolvable:$true] %s713_s24 }
   0x9   :  { %vm136_vm2 = vcmp.ge.s32.totalorder %v135_v21, 64  ;;  %vm137_vm3 = vcmp.lt.s32.totalorder %v135_v21, 96  ;;  %s874_s25 = scalar_lea.vmem %s714_s24, 32  ;;  %p879_p1 = scmp.lt.s32.totalorder %s714_s24, %s714_s24 }
   0xa   :  { %771 = vmatmul.mubr.bf16.vlgmr.msra.gmra.mrb[0].mxu1 %v900_v5  ;;  %777 = vmatpush3.bf16.msra.mxu0 %v950_v4  ;;  %v973_v12 = vsub.s32 %v91_v9, %v93_v10  ;;  %vm138_vm4 = vmand %vm136_vm2, %vm137_vm3  ;;  %p875_p0 = scmp.ne.s32.totalorder %s714_s24, %s874_s25  ;;  %p880_p2 = scmp.lt.s32.totalorder %s874_s25, %s874_s25 }
   0xb   :  { %783 = vmatpush3.bf16.msra.mxu1 %v939_v2  ;;  %786 = vmatprep.mubr.msk.bf16.mxu1 %vm899_vm0, %v898_v1  ;;  %v981_v27 = vsel %vm138_vm4, 1.0, %v902_v26  ;;  %v983_v29 = vsel %vm138_vm4, 0.0, %v902_v26 }
   0xc   :  { %784 = vmatprep.subr.bf16.mxu1 %v898_v1  ;;  %790 = vmatprep.subr.bf16.mxu0 %v898_v1  ;;  %p881_p3 = por %p880_p2, %p879_p1 }
   0xe   :  { %p882_p4 = pnand %p881_p3, %p875_p0 }
   0xf   :  { %785 = vmatpush3.bf16.msra.mxu1 %v950_v4 }
  0x10   :  { %798 = vmatprep.subr.bf16.mxu1 %v898_v1 }
  0xd8   :  { %v79_v13 = vpop.f32.mrb[0].mxu0 }
  0xd9   :  { %v975_v14 = vadd.f32 %v721_v11, %v79_v13  ;;  %v764_v15 = vpop.f32.mrb[1].mxu0 }
  0xda   :  { %v82_v16 = vpop.f32.mrb[2].mxu0 }
  0xdb   :  { %v977_v17 = vadd.f32 %v721_v11, %v82_v16  ;;  %v765_v18 = vpop.f32.mrb[3].mxu0  ;;  %v95_v19 = vrot.slane %v975_v14, %v973_v12  ;;  %v88_v61 = vcombine.high %v975_v14, %v975_v14 }
  0xdd   :  { %v191_v20 = vpop.f32.mrb[0].mxu1  ;;  %v103_v42 = vcombine.high %v95_v19, %v95_v19  ;;  %v102_v62 = vrot.slane %v88_v61, %v973_v12 }
  0xde   :  { %v197_v22 = vadd.f32 %v191_v20, %v95_v19  ;;  %v772_v23 = vpop.f32.mrb[1].mxu1 }
  0xdf   :  { %v194_v24 = vpop.f32.mrb[2].mxu1 }
  0xe0   :  { %842 = vtanh.f32 %v197_v22  ;;  %v773_v25 = vpop.f32.mrb[3].mxu1  ;;  %v104_v22 = vcombine.high %v102_v62, %v102_v62 }
  0xea   :  { %v843_v28 = vpop.eup %842 }
  0xeb   :  { %v199_v30 = vmul.f32 %v843_v28, %v981_v27 }
  0xed   :  { %v200_v31 = vadd.f32 %v199_v30, %v983_v29 }
  0xef   :  { %203 = vrot.lane.b32.xlu0 %v200_v31, %s903_s3  ;;  %v201_v34 = vmul.f32 0.0, %v200_v31 }
 0x161   :  { %v204_v32 = vpop.permute.xlu0 %203 }
 0x162   :  { %v206_v33 = vmul.f32 %v204_v32, %v200_v31 }
 0x164   :  { %208 = vrot.lane.b32.xlu0 %v206_v33, %s904_s22 }
 0x1d6   :  { %v209_v35 = vpop.permute.xlu0 %208 }
 0x1d7   :  { %v211_v36 = vadd.f32 %v209_v35, %v201_v34 }
 0x1d9   :  { %844 = vtanh.f32 %v211_v36 }
 0x1e3   :  { %v845_v37 = vpop.eup %844 }
 0x1e4   :  { %214 = vrot.lane.b32.xlu1 %v845_v37, %s903_s3 }
 0x256   :  { %v215_v38 = vpop.permute.xlu1 %214 }
 0x257   :  { %v217_v39 = vmul.f32 %v215_v38, %v200_v31 }
 0x259   :  { %v218_v40 = vpack.c.bf16 %v217_v39, %v217_v39 }
 0x25b   :  { %220 = vrot.lane.b32.xlu1 %v218_v40, %s904_s22 }
 0x2cd   :  { %v221_v41 = vpop.permute.xlu1 %220 }
 0x2ce   :  { %779 = vmatmul.mubr.msk.bf16.vlgmr.msra.gmra.mrb[4].mxu0 %vm153_vm5, %v221_v41 }
 0x2cf   :  { %791 = vmatpush3.bf16.msra.mxu0 %v939_v2  ;;  %794 = vmatprep.mubr.msk.bf16.mxu0 %vm899_vm0, %v898_v1 }
 0x2d0   :  { %792 = vmatprep.subr.bf16.mxu0 %v898_v1 }
 0x2d3   :  { %793 = vmatpush3.bf16.msra.mxu0 %v950_v4 }
 0x2d4   :  { %806 = vmatprep.subr.bf16.mxu0 %v898_v1 }
 0x3a1   :  { %v259_v43 = vpop.f32.mrb[4].mxu0 }
 0x3a2   :  { %v265_v44 = vadd.f32 %v259_v43, %v103_v42  ;;  %v780_v45 = vpop.f32.mrb[5].mxu0  ;;  %v112_v43 = vrot.slane %v977_v17, %v973_v12 }
 0x3a3   :  { %v262_v46 = vpop.f32.mrb[6].mxu0 }
 0x3a4   :  { %846 = vtanh.f32 %v265_v44  ;;  %v781_v47 = vpop.f32.mrb[7].mxu0 }
 0x3ae   :  { %v847_v48 = vpop.eup %846 }
 0x3af   :  { %v267_v49 = vmul.f32 %v847_v48, %v981_v27 }
 0x3b1   :  { %v268_v50 = vadd.f32 %v267_v49, %v983_v29 }
 0x3b3   :  { %271 = vrot.lane.b32.xlu0 %v268_v50, %s903_s3  ;;  %v269_v53 = vmul.f32 %v268_v50, %v211_v36 }
 0x425   :  { %v272_v51 = vpop.permute.xlu0 %271 }
 0x426   :  { %v274_v52 = vmul.f32 %v272_v51, %v268_v50 }
 0x428   :  { %276 = vrot.lane.b32.xlu1 %v274_v52, %s904_s22 }
 0x49a   :  { %v277_v54 = vpop.permute.xlu1 %276 }
 0x49b   :  { %v279_v55 = vadd.f32 %v277_v54, %v269_v53 }
 0x49d   :  { %848 = vtanh.f32 %v279_v55 }
 0x4a7   :  { %v849_v56 = vpop.eup %848 }
 0x4a8   :  { %282 = vrot.lane.b32.xlu0 %v849_v56, %s903_s3 }
 0x51a   :  { %v283_v57 = vpop.permute.xlu0 %282 }
 0x51b   :  { %v285_v58 = vmul.f32 %v283_v57, %v268_v50 }
 0x51d   :  { %v286_v59 = vpack.c.bf16 %v285_v58, %v285_v58 }
 0x51f   :  { %288 = vrot.lane.b32.xlu1 %v286_v59, %s904_s22 }
 0x591   :  { %v289_v60 = vpop.permute.xlu1 %288 }
 0x592   :  { %787 = vmatmul.mubr.msk.bf16.vlgmr.msra.gmra.mrb[4].mxu1 %vm153_vm5, %v289_v60 }
 0x593   :  { %799 = vmatpush3.bf16.msra.mxu1 %v939_v2  ;;  %802 = vmatprep.mubr.msk.bf16.mxu1 %vm899_vm0, %v898_v1 }
 0x594   :  { %800 = vmatprep.subr.bf16.mxu1 %v898_v1 }
 0x597   :  { %801 = vmatpush3.bf16.msra.mxu1 %v950_v4 }
 0x598   :  { %814 = vmatprep.subr.bf16.mxu1 %v898_v1 }
 0x665   :  { %v327_v63 = vpop.f32.mrb[4].mxu1 }
 0x666   :  { %v333_v0 = vadd.f32 %v327_v63, %v102_v62  ;;  %v788_v3 = vpop.f32.mrb[5].mxu1  ;;  %v120_v62 = vcombine.high %v112_v43, %v112_v43 }
 0x667   :  { %v330_v5 = vpop.f32.mrb[6].mxu1 }
 0x668   :  { %850 = vtanh.f32 %v333_v0  ;;  %v789_v6 = vpop.f32.mrb[7].mxu1 }
 0x672   :  { %v851_v7 = vpop.eup %850 }
 0x673   :  { %v335_v8 = vmul.f32 %v851_v7, %v981_v27 }
 0x675   :  { %v336_v9 = vadd.f32 %v335_v8, %v983_v29 }
 0x677   :  { %339 = vrot.lane.b32.xlu0 %v336_v9, %s903_s3  ;;  %v337_v13 = vmul.f32 %v336_v9, %v279_v55 }
 0x6e9   :  { %v340_v10 = vpop.permute.xlu0 %339 }
 0x6ea   :  { %v342_v11 = vmul.f32 %v340_v10, %v336_v9 }
 0x6ec   :  { %344 = vrot.lane.b32.xlu1 %v342_v11, %s904_s22 }
 0x75e   :  { %v345_v14 = vpop.permute.xlu1 %344 }
 0x75f   :  { %v347_v15 = vadd.f32 %v345_v14, %v337_v13 }
 0x761   :  { %852 = vtanh.f32 %v347_v15 }
 0x76b   :  { %v853_v16 = vpop.eup %852 }
 0x76c   :  { %350 = vrot.lane.b32.xlu0 %v853_v16, %s903_s3 }
 0x7de   :  { %v351_v18 = vpop.permute.xlu0 %350 }
 0x7df   :  { %v353_v19 = vmul.f32 %v351_v18, %v336_v9 }
 0x7e1   :  { %v354_v20 = vpack.c.bf16 %v353_v19, %v353_v19  ;;  %v105_v19 = vcombine.high %v977_v17, %v977_v17 }
 0x7e3   :  { %356 = vrot.lane.b32.xlu1 %v354_v20, %s904_s22  ;;  %v119_v20 = vrot.slane %v105_v19, %v973_v12 }
 0x855   :  { %v357_v21 = vpop.permute.xlu1 %356 }
 0x856   :  { %795 = vmatmul.mubr.msk.bf16.vlgmr.msra.gmra.mrb[8].mxu0 %vm153_vm5, %v357_v21 }
 0x857   :  { %807 = vmatpush3.bf16.msra.mxu0 %v939_v2  ;;  %810 = vmatprep.mubr.msk.bf16.mxu0 %vm899_vm0, %v898_v1 }
 0x858   :  { %808 = vmatprep.subr.bf16.mxu0 %v898_v1 }
 0x85b   :  { %809 = vmatpush3.bf16.msra.mxu0 %v950_v4 }
 0x85c   :  { %822 = vmatprep.subr.bf16.mxu0 %v898_v1 }
 0x929   :  { %v395_v23 = vpop.f32.mrb[8].mxu0 }
 0x92a   :  { %v401_v24 = vadd.f32 %v395_v23, %v104_v22  ;;  %v796_v25 = vpop.f32.mrb[9].mxu0 }
 0x92b   :  { %v398_v26 = vpop.f32.mrb[10].mxu0 }
 0x92c   :  { %854 = vtanh.f32 %v401_v24  ;;  %v797_v28 = vpop.f32.mrb[11].mxu0 }
 0x936   :  { %v855_v30 = vpop.eup %854 }
 0x937   :  { %v403_v31 = vmul.f32 %v855_v30, %v981_v27 }
 0x939   :  { %v404_v32 = vadd.f32 %v403_v31, %v983_v29 }
 0x93b   :  { %407 = vrot.lane.b32.xlu0 %v404_v32, %s903_s3  ;;  %v405_v35 = vmul.f32 %v404_v32, %v347_v15 }
 0x9ad   :  { %v408_v33 = vpop.permute.xlu0 %407 }
 0x9ae   :  { %v410_v34 = vmul.f32 %v408_v33, %v404_v32 }
 0x9b0   :  { %412 = vrot.lane.b32.xlu1 %v410_v34, %s904_s22 }
 0xa22   :  { %v413_v36 = vpop.permute.xlu1 %412 }
 0xa23   :  { %v415_v37 = vadd.f32 %v413_v36, %v405_v35 }
 0xa25   :  { %856 = vtanh.f32 %v415_v37 }
 0xa2f   :  { %v857_v38 = vpop.eup %856 }
 0xa30   :  { %418 = vrot.lane.b32.xlu0 %v857_v38, %s903_s3 }
 0xaa2   :  { %v419_v39 = vpop.permute.xlu0 %418 }
 0xaa3   :  { %v421_v40 = vmul.f32 %v419_v39, %v404_v32 }
 0xaa5   :  { %v422_v41 = vpack.c.bf16 %v421_v40, %v421_v40  ;;  %v121_v40 = vcombine.high %v119_v20, %v119_v20 }
 0xaa7   :  { %424 = vrot.lane.b32.xlu1 %v422_v41, %s904_s22 }
 0xb19   :  { %v425_v42 = vpop.permute.xlu1 %424 }
 0xb1a   :  { %803 = vmatmul.mubr.msk.bf16.vlgmr.msra.gmra.mrb[8].mxu1 %vm153_vm5, %v425_v42 }
 0xb1b   :  { %815 = vmatpush3.bf16.msra.mxu1 %v939_v2  ;;  %818 = vmatprep.mubr.msk.bf16.mxu1 %vm899_vm0, %v898_v1 }
 0xb1c   :  { %816 = vmatprep.subr.bf16.mxu1 %v898_v1 }
 0xb1f   :  { %817 = vmatpush3.bf16.msra.mxu1 %v950_v4 }
 0xbed   :  { %v463_v44 = vpop.f32.mrb[8].mxu1 }
 0xbee   :  { %v469_v45 = vadd.f32 %v463_v44, %v112_v43  ;;  %v804_v46 = vpop.f32.mrb[9].mxu1 }
 0xbef   :  { %v466_v47 = vpop.f32.mrb[10].mxu1 }
 0xbf0   :  { %858 = vtanh.f32 %v469_v45  ;;  %v805_v48 = vpop.f32.mrb[11].mxu1 }
 0xbfa   :  { %v859_v49 = vpop.eup %858 }
 0xbfb   :  { %v471_v50 = vmul.f32 %v859_v49, %v981_v27 }
 0xbfd   :  { %v472_v51 = vadd.f32 %v471_v50, %v983_v29 }
 0xbff   :  { %475 = vrot.lane.b32.xlu0 %v472_v51, %s903_s3  ;;  %v473_v54 = vmul.f32 %v472_v51, %v415_v37 }
 0xc71   :  { %v476_v52 = vpop.permute.xlu0 %475 }
 0xc72   :  { %v478_v53 = vmul.f32 %v476_v52, %v472_v51 }
 0xc74   :  { %480 = vrot.lane.b32.xlu1 %v478_v53, %s904_s22 }
 0xce6   :  { %v481_v55 = vpop.permute.xlu1 %480 }
 0xce7   :  { %v483_v56 = vadd.f32 %v481_v55, %v473_v54 }
 0xce9   :  { %860 = vtanh.f32 %v483_v56 }
 0xcf3   :  { %v861_v57 = vpop.eup %860 }
 0xcf4   :  { %486 = vrot.lane.b32.xlu0 %v861_v57, %s903_s3 }
 0xd66   :  { %v487_v58 = vpop.permute.xlu0 %486 }
 0xd67   :  { %v489_v59 = vmul.f32 %v487_v58, %v472_v51 }
 0xd69   :  { %v490_v60 = vpack.c.bf16 %v489_v59, %v489_v59 }
 0xd6b   :  { %492 = vrot.lane.b32.xlu1 %v490_v60, %s904_s22 }
 0xddd   :  { %v493_v61 = vpop.permute.xlu1 %492 }
 0xdde   :  { %811 = vmatmul.mubr.msk.bf16.vlgmr.msra.gmra.mrb[12].mxu0 %vm153_vm5, %v493_v61 }
 0xddf   :  { %823 = vmatpush3.bf16.msra.mxu0 %v939_v2  ;;  %826 = vmatprep.mubr.msk.bf16.mxu0 %vm899_vm0, %v898_v1 }
 0xde0   :  { %824 = vmatprep.subr.bf16.mxu0 %v898_v1 }
 0xde3   :  { %825 = vmatpush3.bf16.msra.mxu0 %v950_v4 }
 0xeb1   :  { %v531_v63 = vpop.f32.mrb[12].mxu0 }
 0xeb2   :  { %v537_v0 = vadd.f32 %v531_v63, %v120_v62  ;;  %v812_v3 = vpop.f32.mrb[13].mxu0 }
 0xeb3   :  { %v534_v5 = vpop.f32.mrb[14].mxu0 }
 0xeb4   :  { %862 = vtanh.f32 %v537_v0  ;;  %v813_v6 = vpop.f32.mrb[15].mxu0 }
 0xebe   :  { %v863_v7 = vpop.eup %862 }
 0xebf   :  { %v539_v8 = vmul.f32 %v863_v7, %v981_v27 }
 0xec1   :  { %v540_v9 = vadd.f32 %v539_v8, %v983_v29 }
 0xec3   :  { %543 = vrot.lane.b32.xlu0 %v540_v9, %s903_s3  ;;  %v541_v1 = vmul.f32 %v540_v9, %v483_v56 }
 0xf35   :  { %v544_v2 = vpop.permute.xlu0 %543 }
 0xf36   :  { %v546_v10 = vmul.f32 %v544_v2, %v540_v9 }
 0xf38   :  { %548 = vrot.lane.b32.xlu1 %v546_v10, %s904_s22 }
 0xfaa   :  { %v549_v4 = vpop.permute.xlu1 %548 }
 0xfab   :  { %v551_v11 = vadd.f32 %v549_v4, %v541_v1 }
 0xfad   :  { %864 = vtanh.f32 %v551_v11 }
 0xfb7   :  { %v865_v13 = vpop.eup %864 }
 0xfb8   :  { %554 = vrot.lane.b32.xlu0 %v865_v13, %s903_s3 }
0x102a   :  { %v555_v14 = vpop.permute.xlu0 %554 }
0x102b   :  { %v557_v15 = vmul.f32 %v555_v14, %v540_v9 }
0x102d   :  { %v558_v16 = vpack.c.bf16 %v557_v15, %v557_v15 }
0x102f   :  { %560 = vrot.lane.b32.xlu1 %v558_v16, %s904_s22 }
0x10a1   :  { %v561_v18 = vpop.permute.xlu1 %560 }
0x10a2   :  { %819 = vmatmul.mubr.msk.bf16.vlgmr.msra.gmra.mrb[12].mxu1 %vm153_vm5, %v561_v18 }
0x1175   :  { %v599_v21 = vpop.f32.mrb[12].mxu1 }
0x1176   :  { %v605_v22 = vadd.f32 %v599_v21, %v119_v20  ;;  %v820_v23 = vpop.f32.mrb[13].mxu1 }
0x1177   :  { %v602_v24 = vpop.f32.mrb[14].mxu1 }
0x1178   :  { %866 = vtanh.f32 %v605_v22  ;;  %v821_v25 = vpop.f32.mrb[15].mxu1 }
0x1182   :  { %v867_v26 = vpop.eup %866 }
0x1183   :  { %v607_v28 = vmul.f32 %v867_v26, %v981_v27 }
0x1185   :  { %v608_v30 = vadd.f32 %v607_v28, %v983_v29 }
0x1187   :  { %611 = vrot.lane.b32.xlu0 %v608_v30, %s903_s3  ;;  %v609_v17 = vmul.f32 %v608_v30, %v551_v11 }
0x11f9   :  { %v612_v31 = vpop.permute.xlu0 %611 }
0x11fa   :  { %v614_v32 = vmul.f32 %v612_v31, %v608_v30 }
0x11fc   :  { %616 = vrot.lane.b32.xlu1 %v614_v32, %s904_s22 }
0x126e   :  { %v617_v33 = vpop.permute.xlu1 %616 }
0x126f   :  { %v619_v34 = vadd.f32 %v617_v33, %v609_v17 }
0x1271   :  { %868 = vtanh.f32 %v619_v34 }
0x127b   :  { %v869_v35 = vpop.eup %868 }
0x127c   :  { %622 = vrot.lane.b32.xlu0 %v869_v35, %s903_s3 }
0x12ee   :  { %v623_v36 = vpop.permute.xlu0 %622 }
0x12ef   :  { %v625_v37 = vmul.f32 %v623_v36, %v608_v30 }
0x12f1   :  { %v626_v38 = vpack.c.bf16 %v625_v37, %v625_v37 }
0x12f3   :  { %628 = vrot.lane.b32.xlu1 %v626_v38, %s904_s22 }
0x1365   :  { %v629_v39 = vpop.permute.xlu1 %628 }
0x1366   :  { %827 = vmatmul.mubr.msk.bf16.vlgmr.msra.gmra.mrb[16].mxu0 %vm153_vm5, %v629_v39 }
0x1439   :  { %v667_v41 = vpop.f32.mrb[16].mxu0 }
0x143a   :  { %v673_v42 = vadd.f32 %v667_v41, %v121_v40  ;;  %v828_v43 = vpop.f32.mrb[17].mxu0 }
0x143b   :  { %v670_v44 = vpop.f32.mrb[18].mxu0 }
0x143c   :  { %870 = vtanh.f32 %v673_v42  ;;  %v829_v45 = vpop.f32.mrb[19].mxu0 }
0x1446   :  { %v871_v46 = vpop.eup %870 }
0x1447   :  { %v675_v47 = vmul.f32 %v871_v46, %v981_v27 }
0x1449   :  { %v676_v48 = vadd.f32 %v675_v47, %v983_v29 }
0x144b   :  { %679 = vrot.lane.b32.xlu0 %v676_v48, %s903_s3  ;;  %v677_v51 = vmul.f32 %v676_v48, %v619_v34 }
0x14bd   :  { %v680_v49 = vpop.permute.xlu0 %679 }
0x14be   :  { %v682_v50 = vmul.f32 %v680_v49, %v676_v48 }
0x14c0   :  { %684 = vrot.lane.b32.xlu1 %v682_v50, %s904_s22 }
0x1532   :  { %v685_v52 = vpop.permute.xlu1 %684 }
0x1533   :  { %v687_v53 = vadd.f32 %v685_v52, %v677_v51 }
0x1535   :  { %872 = vtanh.f32 %v687_v53 }
0x153f   :  { %v873_v54 = vpop.eup %872 }
0x1540   :  { %690 = vrot.lane.b32.xlu0 %v873_v54, %s903_s3 }
0x15b2   :  { %v691_v55 = vpop.permute.xlu0 %690 }
0x15b3   :  { %v693_v56 = vmul.f32 %v691_v55, %v676_v48 }
0x15b5   :  { %v701_v57 = vrot.slane %v693_v56, %v973_v12 }
0x15b7   :  { %702 = vrot.lane.b32.xlu1 %v701_v57, %s904_s22 }
0x1629   :  { %v703_v27 = vpop.permute.xlu1 %702 }
0x162a   :  { %706 = vst.msk [vmem:[#allocation2] sm:$0x3] %vm705_vm6, %v703_v27 }
0x162b   :  { %885 = shalt.err (!%p882_p4)
}
0x162c   :  { %s886_s28 = scalar_lea.hbm %s1093_s4, 32 }
0x162d   :  { %p887_p5 = scmp.ne.s32.totalorder %s1093_s4, %s886_s28  ;;  %p890_p6 = scmp.lt.u32.totalorder %s886_s28, %s1093_s4 }
0x162f   :  { %p892_p7 = pnand %p890_p6, %p887_p5 }
0x1631   :  { %895 = shalt.err (!%p892_p7)
}
0x1632   :  { %716 = dma.vmem_to_hbm [thread:$0]  %s714_s24, 32, %s1093_s4, [#allocation3]  }
0x1633   :  { %896 = dma.done.wait [#allocation3], 32  }
0x1634   :  { %897 = vsyncadd [#allocation3], 4294967264 }
0x1635   :  { %720 = vsyncpa [#allocation3], 1 }

</bundles_post_ra>
